<compile_context>
chip_gen: v7x
topology: tpu7x:2x2x1
jax: 0.10.0
libtpu: 0.0.40
codegen_flags: <defaults>
</compile_context>

<pallas_src>
import functools

import jax
import jax.numpy as jnp
from jax.experimental import pallas as pl
from jax.experimental.pallas import tpu as pltpu


# ----------------------------------------------------------------------------
# Fused kernel: grid = (metapath p, row tile m, reduction tile k).
# ----------------------------------------------------------------------------
def _metapath_fused_kernel(adj_ref, xw_ref, ws_ref, bs_ref, q_ref,
                           out_ref,
                           acc_ref, z_ref, ssum_ref, m_ref, l_ref,
                           *, inv_n, tm):
    """Tiled GraphConv + online-softmax semantic-attention fusion.

    adj_ref : (1, TM, TK) bf16  tile of the row-normalized adjacency A_p
    xw_ref  : (TK, Fp)    bf16  tile of the pre-projected features H @ W_p
    ws_ref  : (Fp, Dp)    bf16  semantic-attention projection weight (resident)
    bs_ref  : (1, Dp)     f32   semantic-attention projection bias   (resident)
    q_ref   : (1, Dp)     f32   semantic-attention query (row layout, resident)
    out_ref : (N, Fp)     f32   resident output block == online-softmax acc
    acc_ref : (TM, Fp)    f32   K-accumulator for the current row tile
    z_ref   : (N, Fp)     bf16  Z of the CURRENT metapath (no P scaling)
    ssum_ref: (1, Dp)     f32   column-SUM of tanh-projection (current metapath)
    m_ref   : (1, 1)      f32   running max of semantic scores
    l_ref   : (1, 1)      f32   running softmax denominator
    """
    p = pl.program_id(0)
    m = pl.program_id(1)
    k = pl.program_id(2)
    last_p = pl.num_programs(0) - 1
    last_m = pl.num_programs(1) - 1
    last_k = pl.num_programs(2) - 1

    # --- one-time init (sequential grid, first step) --------------------------
    @pl.when((p == 0) & (m == 0) & (k == 0))
    def _global_init():
        out_ref[...] = jnp.zeros_like(out_ref)
        m_ref[...] = jnp.full_like(m_ref, -jnp.inf)
        l_ref[...] = jnp.zeros_like(l_ref)

    # --- per-metapath init -----------------------------------------------------
    @pl.when((m == 0) & (k == 0))
    def _metapath_init():
        ssum_ref[...] = jnp.zeros_like(ssum_ref)

    # --- per-row-tile init -----------------------------------------------------
    @pl.when(k == 0)
    def _rowtile_init():
        acc_ref[...] = jnp.zeros_like(acc_ref)

    # --- GraphConv partial: acc += A_p[m,k] @ (H W_p)[k]  (bf16 MXU, f32 acc) --
    acc_ref[...] += jnp.dot(adj_ref[0], xw_ref[...],
                            preferred_element_type=jnp.float32)

    # --- row tile of Z_p complete: stash (bf16) + score column-sum partial -----
    # mean_n(tanh(.) @ q) == (mean_n tanh(.)) @ q, so only column sums are
    # accumulated across row tiles; the "@ q" and the /N happen once per
    # metapath in the finalize below.
    @pl.when(k == last_k)
    def _rowtile_done():
        z_tile = acc_ref[...]                                   # (TM, Fp) f32
        row0 = pl.multiple_of(m * tm, tm)
        z_ref[pl.ds(row0, tm), :] = z_tile.astype(z_ref.dtype)  # bf16 stash
        proj = jnp.tanh(
            jnp.dot(z_tile.astype(jnp.bfloat16), ws_ref[...],
                    preferred_element_type=jnp.float32)
            + bs_ref[...])                                      # (TM, Dp) f32
        ssum_ref[...] += jnp.sum(proj, axis=0, keepdims=True)   # (1, Dp)

    # --- metapath complete: online-softmax update of the fused accumulator ----
    @pl.when((m == last_m) & (k == last_k))
    def _metapath_done():
        # s_p = (colsum / N) . q   -> (1, 1)
        s_p = jnp.sum(ssum_ref[...] * q_ref[...], axis=-1,
                      keepdims=True) * inv_n
        m_new = jnp.maximum(m_ref[...], s_p)
        alpha = jnp.exp(m_ref[...] - m_new)                     # rescale old acc
        w_p = jnp.exp(s_p - m_new)                              # weight of Z_p
        out_ref[...] = (alpha * out_ref[...]
                        + w_p * z_ref[...].astype(jnp.float32))
        l_ref[...] = alpha * l_ref[...] + w_p
        m_ref[...] = m_new

    # --- very last step: normalize by the softmax denominator ------------------
    @pl.when((p == last_p) & (m == last_m) & (k == last_k))
    def _finalize():
        out_ref[...] = out_ref[...] * pl.reciprocal(l_ref[...], approx=True)


# ----------------------------------------------------------------------------
# MetapathConv forward wrapper.
# ----------------------------------------------------------------------------
def _round_up(x, m):
    return ((x + m - 1) // m) * m


def _pick_tile(n):
    # >= 512 reaches ~85% of the HBM roofline (tile-size sweep); fall back to
    # smaller divisors, then to the full extent for small / awkward N.
    for t in (512, 256, 128):
        if n >= t and n % t == 0:
            return t
    return n


def metapath_conv_forward(adj, h, w, ws, bs, q, *,
                          tm=None, tk=None, return_padded=False):
    """adj:(P,N,N) (bf16 preferred, any float ok), h:(N,Fin) f32,
    w:(P,Fin,Fout), ws:(Fout,Dh), bs:(1,Dh), q:(Dh,1).
    Returns fused embeddings (N, Fout) f32 (or (N, Fp) if return_padded)."""
    P, N, _ = adj.shape
    Fin = h.shape[1]
    Fout = w.shape[2]
    Dh = ws.shape[1]

    # Lane-dense padded widths (unmasked vst on every Z / out store).
    Fp = _round_up(max(Fout, 128), 128)
    Dp = _round_up(max(Dh, 128), 128)

    tm = _pick_tile(N) if tm is None else tm
    tk = _pick_tile(N) if tk is None else tk
    assert N % tm == 0 and N % tk == 0, "pad N to a multiple of the tile size"

    # Hoist the per-metapath projection into ONE (N,Fin)@(Fin,P*Fp) matmul and
    # KEEP the (N, P*Fp) layout: the kernel picks the p-th 128-wide column
    # block directly (no wrapper-side HBM relayout).
    w_pad = jnp.pad(w, ((0, 0), (0, 0), (0, Fp - Fout)))             # (P,Fin,Fp)
    w_all = jnp.transpose(w_pad, (1, 0, 2)).reshape(Fin, P * Fp)     # (Fin,P*Fp)
    xw = jnp.dot(h, w_all,
                 preferred_element_type=jnp.float32).astype(jnp.bfloat16)

    ws_p = jnp.pad(ws, ((0, Fp - Fout), (0, Dp - Dh))).astype(jnp.bfloat16)
    bs_p = jnp.pad(bs.reshape(1, Dh), ((0, 0), (0, Dp - Dh))).astype(jnp.float32)
    q_p = jnp.pad(q.reshape(1, Dh), ((0, 0), (0, Dp - Dh))).astype(jnp.float32)

    # No-op when the producer already emits bf16 (preferred: no standalone
    # HBM cast pass over the dominant P*N^2 tensor).
    adj_b = jnp.asarray(adj, jnp.bfloat16)

    kernel = functools.partial(_metapath_fused_kernel,
                               inv_n=1.0 / float(N), tm=tm)

    out_pad = pl.pallas_call(
        kernel,
        out_shape=jax.ShapeDtypeStruct((N, Fp), jnp.float32),
        grid_spec=pltpu.PrefetchScalarGridSpec(
            num_scalar_prefetch=0,
            grid=(P, N // tm, N // tk),          # reduction axis last
            in_specs=[
                # A_p tile (bf16), streamed — the dominant HBM traffic.
                pl.BlockSpec((1, tm, tk), lambda p, m, k: (p, m, k)),
                # (H W_p) K-tile, picked straight out of the (N, P*Fp) slab.
                pl.BlockSpec((tk, Fp), lambda p, m, k: (k, p)),
                # Small resident operands: single-buffered.
                pl.BlockSpec((Fp, Dp), lambda p, m, k: (0, 0),
                             pipeline_mode=pl.Buffered(1)),
                pl.BlockSpec((1, Dp), lambda p, m, k: (0, 0),
                             pipeline_mode=pl.Buffered(1)),
                pl.BlockSpec((1, Dp), lambda p, m, k: (0, 0),
                             pipeline_mode=pl.Buffered(1)),
            ],
            # Resident output block doubles as the online-softmax accumulator.
            out_specs=pl.BlockSpec((N, Fp), lambda p, m, k: (0, 0)),
            scratch_shapes=[
                pltpu.VMEM((tm, Fp), jnp.float32),   # K-accumulator (row tile)
                pltpu.VMEM((N, Fp), jnp.bfloat16),   # Z of current metapath
                pltpu.VMEM((1, Dp), jnp.float32),    # score column-sum
                pltpu.VMEM((1, 1), jnp.float32),     # running max
                pltpu.VMEM((1, 1), jnp.float32),     # running denominator
            ],
        ),
        # Carried state (output acc + scratches) across every grid axis ->
        # all axes sequential. (Megacore split would need a cross-core-safe
        # score combine first — see review.)
        compiler_params=pltpu.CompilerParams(
            dimension_semantics=("arbitrary", "arbitrary", "arbitrary"),
        ),
    )(adj_b, xw, ws_p, bs_p, q_p)

    if return_padded:
        return out_pad          # lane-dense padded layout, no strided slice
    return out_pad[:, :Fout]


if __name__ == "__main__":
    P, N = 3, 128          # metapaths, nodes
    F_in, F_out = 32, 64   # input / output feature dims
    Dh = 128               # semantic-attention hidden dim

    key = jax.random.PRNGKey(0)
    k_adj, k_h, k_w, k_ws, k_bs, k_q = jax.random.split(key, 6)

    # Dense metapath adjacencies: random mask + self loops, row-normalized.
    raw = (jax.random.uniform(k_adj, (P, N, N)) < 0.05).astype(jnp.float32)
    eye = jnp.broadcast_to(jnp.eye(N, dtype=jnp.float32), (P, N, N))
    adj_f32 = raw + eye
    adj_f32 = adj_f32 / jnp.sum(adj_f32, axis=-1, keepdims=True)
    # Emit the adjacency in bf16 at the producer (no separate cast pass later).
    adj = adj_f32.astype(jnp.bfloat16)

    # Node features and deterministic parameter init.
    h = jax.random.normal(k_h, (N, F_in), dtype=jnp.float32)
    w = jax.random.normal(k_w, (P, F_in, F_out), dtype=jnp.float32) * 0.1
    ws = jax.random.normal(k_ws, (F_out, Dh), dtype=jnp.float32) * 0.1
    bs = jax.random.normal(k_bs, (1, Dh), dtype=jnp.float32) * 0.1
    q = jax.random.normal(k_q, (Dh, 1), dtype=jnp.float32) * 0.1

    out = metapath_conv_forward(adj, h, w, ws, bs, q)
    jax.block_until_ready(out)
    assert out.shape == (N, F_out) and out.dtype == jnp.float32

    # Reference 1: same bf16 quantization of A and H @ W as the kernel inputs.
    adj_q = adj.astype(jnp.float32)
    xw_q = jnp.einsum("nf,pfo->pno", h, w).astype(jnp.bfloat16).astype(jnp.float32)
    z = jnp.einsum("pij,pjf->pif", adj_q, xw_q)                  # (P, N, Fout)
    proj = jnp.tanh(jnp.einsum("pnf,fd->pnd", z, ws) + bs)        # (P, N, Dh)
    scores = jnp.einsum("pd,dk->pk", jnp.mean(proj, axis=1), q)[:, 0]
    beta = jax.nn.softmax(scores)
    ref = jnp.einsum("p,pnf->nf", beta, z)
    assert bool(jnp.allclose(out, ref, rtol=2e-2, atol=2e-2))

    # Reference 2: true f32 openhgnn semantics (no quantization), looser tol.
    z32 = jnp.einsum("pij,pjf->pif", adj_f32, jnp.einsum("nf,pfo->pno", h, w))
    proj32 = jnp.tanh(jnp.einsum("pnf,fd->pnd", z32, ws) + bs)
    s32 = jnp.einsum("pd,dk->pk", jnp.mean(proj32, axis=1), q)[:, 0]
    ref32 = jnp.einsum("p,pnf->nf", jax.nn.softmax(s32), z32)
    assert bool(jnp.allclose(out, ref32, rtol=5e-2, atol=5e-2))

    print("KERNEL_OK")
</pallas_src>

<mosaic_0001>
module attributes {stable_mosaic.version = 11 : i64} {
  func.func @_metapath_fused_kernel(%arg0: i32, %arg1: i32, %arg2: i32, %arg3: memref<1x128x128xbf16, #tpu.memory_space<vmem>>, %arg4: memref<128x128xbf16, #tpu.memory_space<vmem>>, %arg5: memref<128x128xbf16, #tpu.memory_space<vmem>>, %arg6: memref<1x128xf32, #tpu.memory_space<vmem>>, %arg7: memref<1x128xf32, #tpu.memory_space<vmem>>, %arg8: memref<128x128xf32, #tpu.memory_space<vmem>>, %arg9: memref<128x128xf32, #tpu.memory_space<vmem>>, %arg10: memref<128x128xbf16, #tpu.memory_space<vmem>>, %arg11: memref<1x128xf32, #tpu.memory_space<vmem>>, %arg12: memref<1x1xf32, #tpu.memory_space<vmem>>, %arg13: memref<1x1xf32, #tpu.memory_space<vmem>>) attributes {dimension_semantics = [#tpu.dimension_semantics<arbitrary>, #tpu.dimension_semantics<arbitrary>, #tpu.dimension_semantics<arbitrary>], iteration_bounds = array<i64: 3, 1, 1>, scalar_prefetch = 0 : i64, scratch_operands = 5 : i64, tpu.core_type = #tpu.core_type<tc>, window_params = [{transform_indices = @transform_0, window_bounds = array<i64: 1, 128, 128>}, {transform_indices = @transform_1, window_bounds = array<i64: 128, 128>}, {pipeline_mode = #tpu.pipeline_mode<synchronous>, transform_indices = @transform_2, window_bounds = array<i64: 128, 128>}, {pipeline_mode = #tpu.pipeline_mode<synchronous>, transform_indices = @transform_3, window_bounds = array<i64: 1, 128>}, {pipeline_mode = #tpu.pipeline_mode<synchronous>, transform_indices = @transform_4, window_bounds = array<i64: 1, 128>}, {pipeline_mode = #tpu.pipeline_mode<synchronous>, transform_indices = @transform_5, window_bounds = array<i64: 128, 128>}]} {
    %c0_i32 = arith.constant 0 : i32
    %0 = arith.cmpi eq, %arg0, %c0_i32 : i32
    %c0_i32_0 = arith.constant 0 : i32
    %1 = arith.cmpi eq, %arg1, %c0_i32_0 : i32
    %2 = arith.andi %0, %1 : i1
    %c0_i32_1 = arith.constant 0 : i32
    %3 = arith.cmpi eq, %arg2, %c0_i32_1 : i32
    %4 = arith.andi %2, %3 : i1
    %5 = arith.extui %4 : i1 to i32
    %c0_i32_2 = arith.constant 0 : i32
    %6 = arith.cmpi ne, %5, %c0_i32_2 : i32
    scf.if %6 {
      %cst_24 = arith.constant 0.000000e+00 : f32
      %37 = vector.broadcast %cst_24 : f32 to vector<128x128xf32>
      %c0_25 = arith.constant 0 : index
      %c0_26 = arith.constant 0 : index
      %38 = vector.load %arg8[%c0_25, %c0_26] : memref<128x128xf32, #tpu.memory_space<vmem>>, vector<128x128xf32>
      tpu.vector_store %arg8[%c0_25, %c0_26], %37 {strides = array<i32>} : memref<128x128xf32, #tpu.memory_space<vmem>>, vector<128x128xf32>,
      %cst_27 = arith.constant 0xFF800000 : f32
      %39 = vector.broadcast %cst_27 : f32 to vector<1x1xf32>
      %c0_28 = arith.constant 0 : index
      %c0_29 = arith.constant 0 : index
      %40 = vector.load %arg12[%c0_28, %c0_29] : memref<1x1xf32, #tpu.memory_space<vmem>>, vector<1x1xf32>
      tpu.vector_store %arg12[%c0_28, %c0_29], %39 {strides = array<i32>} : memref<1x1xf32, #tpu.memory_space<vmem>>, vector<1x1xf32>,
      %cst_30 = arith.constant 0.000000e+00 : f32
      %41 = vector.broadcast %cst_30 : f32 to vector<1x1xf32>
      %c0_31 = arith.constant 0 : index
      %c0_32 = arith.constant 0 : index
      %42 = vector.load %arg13[%c0_31, %c0_32] : memref<1x1xf32, #tpu.memory_space<vmem>>, vector<1x1xf32>
      tpu.vector_store %arg13[%c0_31, %c0_32], %41 {strides = array<i32>} : memref<1x1xf32, #tpu.memory_space<vmem>>, vector<1x1xf32>,
    } else {
    }
    %c0_i32_3 = arith.constant 0 : i32
    %7 = arith.cmpi eq, %arg1, %c0_i32_3 : i32
    %c0_i32_4 = arith.constant 0 : i32
    %8 = arith.cmpi eq, %arg2, %c0_i32_4 : i32
    %9 = arith.andi %7, %8 : i1
    %10 = arith.extui %9 : i1 to i32
    %c0_i32_5 = arith.constant 0 : i32
    %11 = arith.cmpi ne, %10, %c0_i32_5 : i32
    scf.if %11 {
      %cst_24 = arith.constant 0.000000e+00 : f32
      %37 = vector.broadcast %cst_24 : f32 to vector<1x128xf32>
      %c0_25 = arith.constant 0 : index
      %c0_26 = arith.constant 0 : index
      %38 = vector.load %arg11[%c0_25, %c0_26] : memref<1x128xf32, #tpu.memory_space<vmem>>, vector<1x128xf32>
      tpu.vector_store %arg11[%c0_25, %c0_26], %37 {strides = array<i32>} : memref<1x128xf32, #tpu.memory_space<vmem>>, vector<1x128xf32>,
    } else {
    }
    %c0_i32_6 = arith.constant 0 : i32
    %12 = arith.cmpi eq, %arg2, %c0_i32_6 : i32
    %13 = arith.extui %12 : i1 to i32
    %c0_i32_7 = arith.constant 0 : i32
    %14 = arith.cmpi ne, %13, %c0_i32_7 : i32
    scf.if %14 {
      %cst_24 = arith.constant 0.000000e+00 : f32
      %37 = vector.broadcast %cst_24 : f32 to vector<128x128xf32>
      %c0_25 = arith.constant 0 : index
      %c0_26 = arith.constant 0 : index
      %38 = vector.load %arg9[%c0_25, %c0_26] : memref<128x128xf32, #tpu.memory_space<vmem>>, vector<128x128xf32>
      tpu.vector_store %arg9[%c0_25, %c0_26], %37 {strides = array<i32>} : memref<128x128xf32, #tpu.memory_space<vmem>>, vector<128x128xf32>,
    } else {
    }
    %c0 = arith.constant 0 : index
    %c0_8 = arith.constant 0 : index
    %15 = vector.load %arg9[%c0, %c0_8] : memref<128x128xf32, #tpu.memory_space<vmem>>, vector<128x128xf32>
    %c0_9 = arith.constant 0 : index
    %c0_10 = arith.constant 0 : index
    %c0_11 = arith.constant 0 : index
    %16 = vector.load %arg3[%c0_9, %c0_10, %c0_11] : memref<1x128x128xbf16, #tpu.memory_space<vmem>>, vector<1x128x128xbf16>
    %17 = vector.shape_cast %16 : vector<1x128x128xbf16> to vector<128x128xbf16>
    %c0_12 = arith.constant 0 : index
    %c0_13 = arith.constant 0 : index
    %18 = vector.load %arg4[%c0_12, %c0_13] : memref<128x128xbf16, #tpu.memory_space<vmem>>, vector<128x128xbf16>
    %cst = arith.constant dense<0.000000e+00> : vector<128x128xf32>
    %19 = tpu.matmul %17, %18, %cst {dimension_numbers = #tpu.dot_dimension_numbers<[1], [0], [0], [1], [0, 0, 1, 1], [], []>} : vector<128x128xbf16>, vector<128x128xbf16>, vector<128x128xf32> -> vector<128x128xf32>
    %20 = arith.addf %15, %19 : vector<128x128xf32>
    %c0_14 = arith.constant 0 : index
    %c0_15 = arith.constant 0 : index
    %21 = vector.load %arg9[%c0_14, %c0_15] : memref<128x128xf32, #tpu.memory_space<vmem>>, vector<128x128xf32>
    tpu.vector_store %arg9[%c0_14, %c0_15], %20 {strides = array<i32>} : memref<128x128xf32, #tpu.memory_space<vmem>>, vector<128x128xf32>,
    %c0_i32_16 = arith.constant 0 : i32
    %22 = arith.cmpi eq, %arg2, %c0_i32_16 : i32
    %23 = arith.extui %22 : i1 to i32
    %c0_i32_17 = arith.constant 0 : i32
    %24 = arith.cmpi ne, %23, %c0_i32_17 : i32
    scf.if %24 {
      %c0_24 = arith.constant 0 : index
      %c0_25 = arith.constant 0 : index
      %37 = vector.load %arg9[%c0_24, %c0_25] : memref<128x128xf32, #tpu.memory_space<vmem>>, vector<128x128xf32>
      %c128_i32 = arith.constant 128 : i32
      %38 = arith.muli %arg1, %c128_i32 : i32
      %39 = tpu.assume_multiple %38, 128 : i32
      %40 = arith.truncf %37 : vector<128x128xf32> to vector<128x128xbf16>
      %41 = arith.index_cast %39 : i32 to index
      %c0_26 = arith.constant 0 : index
      %42 = vector.load %arg10[%41, %c0_26] : memref<128x128xbf16, #tpu.memory_space<vmem>>, vector<128x128xbf16>
      tpu.vector_store %arg10[%41, %c0_26], %40 {strides = array<i32>} : memref<128x128xbf16, #tpu.memory_space<vmem>>, vector<128x128xbf16>,
      %43 = arith.truncf %37 : vector<128x128xf32> to vector<128x128xbf16>
      %c0_27 = arith.constant 0 : index
      %c0_28 = arith.constant 0 : index
      %44 = vector.load %arg5[%c0_27, %c0_28] : memref<128x128xbf16, #tpu.memory_space<vmem>>, vector<128x128xbf16>
      %cst_29 = arith.constant dense<0.000000e+00> : vector<128x128xf32>
      %45 = tpu.matmul %43, %44, %cst_29 {dimension_numbers = #tpu.dot_dimension_numbers<[1], [0], [0], [1], [0, 0, 1, 1], [], []>} : vector<128x128xbf16>, vector<128x128xbf16>, vector<128x128xf32> -> vector<128x128xf32>
      %c0_30 = arith.constant 0 : index
      %c0_31 = arith.constant 0 : index
      %46 = vector.load %arg6[%c0_30, %c0_31] : memref<1x128xf32, #tpu.memory_space<vmem>>, vector<1x128xf32>
      %47 = vector.broadcast %46 : vector<1x128xf32> to vector<128x128xf32>
      %48 = arith.addf %45, %47 : vector<128x128xf32>
      %49 = math.tanh %48 : vector<128x128xf32>
      %c0_32 = arith.constant 0 : index
      %c0_33 = arith.constant 0 : index
      %50 = vector.load %arg11[%c0_32, %c0_33] : memref<1x128xf32, #tpu.memory_space<vmem>>, vector<1x128xf32>
      %cst_34 = arith.constant dense<0.000000e+00> : vector<128xf32>
      %51 = vector.multi_reduction <add>, %49, %cst_34 [0] : vector<128x128xf32> to vector<128xf32>
      %52 = vector.shape_cast %51 : vector<128xf32> to vector<1x128xf32>
      %53 = arith.addf %50, %52 : vector<1x128xf32>
      %c0_35 = arith.constant 0 : index
      %c0_36 = arith.constant 0 : index
      %54 = vector.load %arg11[%c0_35, %c0_36] : memref<1x128xf32, #tpu.memory_space<vmem>>, vector<1x128xf32>
      tpu.vector_store %arg11[%c0_35, %c0_36], %53 {strides = array<i32>} : memref<1x128xf32, #tpu.memory_space<vmem>>, vector<1x128xf32>,
    } else {
    }
    %c0_i32_18 = arith.constant 0 : i32
    %25 = arith.cmpi eq, %arg1, %c0_i32_18 : i32
    %c0_i32_19 = arith.constant 0 : i32
    %26 = arith.cmpi eq, %arg2, %c0_i32_19 : i32
    %27 = arith.andi %25, %26 : i1
    %28 = arith.extui %27 : i1 to i32
    %c0_i32_20 = arith.constant 0 : i32
    %29 = arith.cmpi ne, %28, %c0_i32_20 : i32
    scf.if %29 {
      %c0_24 = arith.constant 0 : index
      %c0_25 = arith.constant 0 : index
      %37 = vector.load %arg11[%c0_24, %c0_25] : memref<1x128xf32, #tpu.memory_space<vmem>>, vector<1x128xf32>
      %c0_26 = arith.constant 0 : index
      %c0_27 = arith.constant 0 : index
      %38 = vector.load %arg7[%c0_26, %c0_27] : memref<1x128xf32, #tpu.memory_space<vmem>>, vector<1x128xf32>
      %39 = arith.mulf %37, %38 : vector<1x128xf32>
      %cst_28 = arith.constant dense<0.000000e+00> : vector<1xf32>
      %40 = vector.multi_reduction <add>, %39, %cst_28 [1] : vector<1x128xf32> to vector<1xf32>
      %41 = vector.shape_cast %40 : vector<1xf32> to vector<1x1xf32>
      %cst_29 = arith.constant 7.812500e-03 : f32
      %42 = vector.broadcast %cst_29 : f32 to vector<1x1xf32>
      %43 = arith.mulf %41, %42 : vector<1x1xf32>
      %c0_30 = arith.constant 0 : index
      %c0_31 = arith.constant 0 : index
      %44 = vector.load %arg12[%c0_30, %c0_31] : memref<1x1xf32, #tpu.memory_space<vmem>>, vector<1x1xf32>
      %45 = arith.maximumf %44, %43 : vector<1x1xf32>
      %c0_32 = arith.constant 0 : index
      %c0_33 = arith.constant 0 : index
      %46 = vector.load %arg12[%c0_32, %c0_33] : memref<1x1xf32, #tpu.memory_space<vmem>>, vector<1x1xf32>
      %47 = arith.subf %46, %45 : vector<1x1xf32>
      %48 = math.exp %47 : vector<1x1xf32>
      %49 = arith.subf %43, %45 : vector<1x1xf32>
      %50 = math.exp %49 : vector<1x1xf32>
      %c0_34 = arith.constant 0 : index
      %c0_35 = arith.constant 0 : index
      %51 = vector.load %arg8[%c0_34, %c0_35] : memref<128x128xf32, #tpu.memory_space<vmem>>, vector<128x128xf32>
      %52 = vector.broadcast %48 : vector<1x1xf32> to vector<128x128xf32>
      %53 = arith.mulf %52, %51 : vector<128x128xf32>
      %c0_36 = arith.constant 0 : index
      %c0_37 = arith.constant 0 : index
      %54 = vector.load %arg10[%c0_36, %c0_37] : memref<128x128xbf16, #tpu.memory_space<vmem>>, vector<128x128xbf16>
      %55 = arith.extf %54 : vector<128x128xbf16> to vector<128x128xf32>
      %56 = vector.broadcast %50 : vector<1x1xf32> to vector<128x128xf32>
      %57 = arith.mulf %56, %55 : vector<128x128xf32>
      %58 = arith.addf %53, %57 : vector<128x128xf32>
      %c0_38 = arith.constant 0 : index
      %c0_39 = arith.constant 0 : index
      %59 = vector.load %arg8[%c0_38, %c0_39] : memref<128x128xf32, #tpu.memory_space<vmem>>, vector<128x128xf32>
      tpu.vector_store %arg8[%c0_38, %c0_39], %58 {strides = array<i32>} : memref<128x128xf32, #tpu.memory_space<vmem>>, vector<128x128xf32>,
      %c0_40 = arith.constant 0 : index
      %c0_41 = arith.constant 0 : index
      %60 = vector.load %arg13[%c0_40, %c0_41] : memref<1x1xf32, #tpu.memory_space<vmem>>, vector<1x1xf32>
      %61 = arith.mulf %48, %60 : vector<1x1xf32>
      %62 = arith.addf %61, %50 : vector<1x1xf32>
      %c0_42 = arith.constant 0 : index
      %c0_43 = arith.constant 0 : index
      %63 = vector.load %arg13[%c0_42, %c0_43] : memref<1x1xf32, #tpu.memory_space<vmem>>, vector<1x1xf32>
      tpu.vector_store %arg13[%c0_42, %c0_43], %62 {strides = array<i32>} : memref<1x1xf32, #tpu.memory_space<vmem>>, vector<1x1xf32>,
      %c0_44 = arith.constant 0 : index
      %c0_45 = arith.constant 0 : index
      %64 = vector.load %arg12[%c0_44, %c0_45] : memref<1x1xf32, #tpu.memory_space<vmem>>, vector<1x1xf32>
      tpu.vector_store %arg12[%c0_44, %c0_45], %45 {strides = array<i32>} : memref<1x1xf32, #tpu.memory_space<vmem>>, vector<1x1xf32>,
    } else {
    }
    %c2_i32 = arith.constant 2 : i32
    %30 = arith.cmpi eq, %arg0, %c2_i32 : i32
    %c0_i32_21 = arith.constant 0 : i32
    %31 = arith.cmpi eq, %arg1, %c0_i32_21 : i32
    %32 = arith.andi %30, %31 : i1
    %c0_i32_22 = arith.constant 0 : i32
    %33 = arith.cmpi eq, %arg2, %c0_i32_22 : i32
    %34 = arith.andi %32, %33 : i1
    %35 = arith.extui %34 : i1 to i32
    %c0_i32_23 = arith.constant 0 : i32
    %36 = arith.cmpi ne, %35, %c0_i32_23 : i32
    scf.if %36 {
      %c0_24 = arith.constant 0 : index
      %c0_25 = arith.constant 0 : index
      %37 = vector.load %arg8[%c0_24, %c0_25] : memref<128x128xf32, #tpu.memory_space<vmem>>, vector<128x128xf32>
      %c0_26 = arith.constant 0 : index
      %c0_27 = arith.constant 0 : index
      %38 = vector.load %arg13[%c0_26, %c0_27] : memref<1x1xf32, #tpu.memory_space<vmem>>, vector<1x1xf32>
      %39 = tpu.reciprocal %38 {approx = true} : vector<1x1xf32> -> vector<1x1xf32>
      %40 = vector.broadcast %39 : vector<1x1xf32> to vector<128x128xf32>
      %41 = arith.mulf %37, %40 : vector<128x128xf32>
      %c0_28 = arith.constant 0 : index
      %c0_29 = arith.constant 0 : index
      %42 = vector.load %arg8[%c0_28, %c0_29] : memref<128x128xf32, #tpu.memory_space<vmem>>, vector<128x128xf32>
      tpu.vector_store %arg8[%c0_28, %c0_29], %41 {strides = array<i32>} : memref<128x128xf32, #tpu.memory_space<vmem>>, vector<128x128xf32>,
    } else {
    }
    return
  }
  func.func @transform_0(%arg0: i32, %arg1: i32, %arg2: i32) -> (i32, i32, i32) {
    %c0_i32 = arith.constant 0 : i32
    return %arg0, %arg1, %arg2 : i32, i32, i32
  }
  func.func @transform_1(%arg0: i32, %arg1: i32, %arg2: i32) -> (i32, i32) {
    %c0_i32 = arith.constant 0 : i32
    return %arg2, %arg0 : i32, i32
  }
  func.func @transform_2(%arg0: i32, %arg1: i32, %arg2: i32) -> (i32, i32) {
    %c0_i32 = arith.constant 0 : i32
    %c0_i32_0 = arith.constant 0 : i32
    %c0_i32_1 = arith.constant 0 : i32
    return %c0_i32, %c0_i32_0 : i32, i32
  }
  func.func @transform_3(%arg0: i32, %arg1: i32, %arg2: i32) -> (i32, i32) {
    %c0_i32 = arith.constant 0 : i32
    %c0_i32_0 = arith.constant 0 : i32
    %c0_i32_1 = arith.constant 0 : i32
    return %c0_i32, %c0_i32_0 : i32, i32
  }
  func.func @transform_4(%arg0: i32, %arg1: i32, %arg2: i32) -> (i32, i32) {
    %c0_i32 = arith.constant 0 : i32
    %c0_i32_0 = arith.constant 0 : i32
    %c0_i32_1 = arith.constant 0 : i32
    return %c0_i32, %c0_i32_0 : i32, i32
  }
  func.func @transform_5(%arg0: i32, %arg1: i32, %arg2: i32) -> (i32, i32) {
    %c0_i32 = arith.constant 0 : i32
    %c0_i32_0 = arith.constant 0 : i32
    %c0_i32_1 = arith.constant 0 : i32
    return %c0_i32, %c0_i32_0 : i32, i32
  }
}

</mosaic_0001>

<bundles_post_ra>
// kernel: tpu_custom_call.1
= control target key start
LH: loop header
LB: loop body
LE: loop exit
PB: predicated region body
PF: predicated region fallthrough
CT: control target
= control target key end

     0   :  { %10 = vsyncpa [#allocation8], 0  ;;  %s2039_s0 = inlined_call_operand.hbm [shape: bf16[3,128,128], index: 0, kind: input, shape index: {}]   ;;  %s2040_s1 = inlined_call_operand.hbm [shape: bf16[128,384], index: 1, kind: input, shape index: {}]   ;;  %s2041_s2 = inlined_call_operand.hbm [shape: bf16[128,128], index: 2, kind: input, shape index: {}]   ;;  %s2042_s3 = inlined_call_operand.vmem [shape: f32[1,128], index: 3, kind: input, shape index: {}]   ;;  %s2043_s4 = inlined_call_operand.vmem [shape: f32[1,128], index: 4, kind: input, shape index: {}]   ;;  %s2044_s5 = inlined_call_operand.hbm [shape: f32[128,128], index: 5, kind: output, shape index: {}]  }
   0x1   :  { %12 = vsyncpa [#allocation8 + $0x1], 0 }
   0x2   :  { %13 = vsyncpa [#allocation11], 0 }
   0x3   :  { %15 = vsyncpa [#allocation11 + $0x1], 0 }
   0x4   :  { %16 = vsyncpa [#allocation9], 0  ;;  %s1732_s18 = smov 0   ;;  %s1734_s19 = smov 0  }
   0x5   :  { %s1736_s20 = smov 0   ;;  %s1738_s21 = smov 0  }
   0x6   :  { %s1740_s22 = smov 0   ;;  %s1742_s23 = smov 0  }
   0x7 LB: > { %s1761_s24 = sadd.s32 4294967295, %s1686_s23   ;;  %p65_p0 = scmp.ne.s32.totalorder %s1670_s19, %s1666_s18  ;;  %s1686_s23 = sphi %s1742_s23, %s22_s23   ;;  %s1682_s22 = sphi %s1740_s22, %s2063_s22   ;;  %s1678_s21 = sphi %s1738_s21, %s2062_s21   ;;  %s1674_s20 = sphi %s1736_s20, %s2061_s20   ;;  %s1670_s19 = sphi %s1734_s19, %s2060_s19   ;;  %s1666_s18 = sphi %s1732_s18, %s2059_s18  }
   0x8   : > { %p2045_p1 = scmp.eq.s32.totalorder %s1761_s24, 0  ;;  %p1210_p2 = scmp.ge.s32.totalorder %s1686_s23, 1 }
   0x9   : > { %p188_p3 = scmp.lt.s32.totalorder %s1686_s23, 4  ;;  %s1688_s27 = smov [#allocation12]  }
   0xa   : > { %p1769_p4 = por %p2045_p1, %p65_p0  ;;  %s200_s28 = sshll.u32 %s1688_s27, 4  ;;  %s201_s28 = int_to_ptr.vmem [resolvable:$true] %s200_s28 }
   0xb   : > { %p1773_p5 = pnand %p1210_p2, %p188_p3  ;;  %s41_s30 = sadd.s32 1, %s1682_s22 }
   0xc   : > { %s2050_s25 = scalar_select %p1769_p4, 1, 0 }
   0xd   : > { %s2051_s26 = scalar_select %p1773_p5, 1, 0 }
   0xe   : > { %p1370_p6 = pneg %p1773_p5  ;;  %s1510_s8 = scalar_lea.hbm %s2041_s2, 1024 }
   0xf   : > { %p1511_p8 = scmp.ne.s32.totalorder %s2041_s2, %s1510_s8  ;;  %p1517_p12 = scmp.lt.u32.totalorder %s1510_s8, %s2041_s2 }
  0x10   : > { %p1781_p7 = pnand %p1370_p6, %p2045_p1 }
  0x12   : > { %p1512_p9 = pneg %p1781_p7 }
  0x14   : > { %p1513_p10 = pnand %p1512_p9, %p1511_p8 }
  0x16   : > { %p1514_p11 = pneg %p1513_p10 }
  0x18   : > { %p1519_p13 = pnand %p1517_p12, %p1514_p11 }
  0x1a   : > { %1522 = shalt.err (!%p1519_p13)
}
  0x1b   : > { %s1523_s13 = scalar_lea.vmem %s201_s28, 1024  ;;  %p1531_p6 = scmp.lt.s32.totalorder %s201_s28, %s201_s28 }
  0x1c   : > { %p1524_p0 = scmp.ne.s32.totalorder %s201_s28, %s1523_s13  ;;  %p1532_p1 = scmp.lt.s32.totalorder %s1523_s13, %s1523_s13 }
  0x1e   : > { %p1526_p2 = pnand %p1524_p0, %p1512_p9  ;;  %p1533_p4 = por %p1532_p1, %p1531_p6 }
  0x20   : > { %p1527_p3 = pneg %p1526_p2 }
  0x22   : > { %p1534_p5 = pnand %p1533_p4, %p1527_p3 }
  0x24   : > { %1537 = shalt.err (!%p1534_p5)
}
  0x25   : > { %s2048_s14 = smov 64   ;;  %s1690_s15 = smov 4  }
  0x26   : > { %1373 = dma.hbm_to_vmem [thread:$0]  (!%p1781_p7), %s2041_s2, 1024, %s201_s28, [#allocation11], %s2048_s14, %s2048_s14, %s1690_s15  }
  0x27   : > { %p43_p1 = scmp.ge.s32.totalorder %s41_s30, 3  ;;  %s52_s18 = sadd.s32 1, %s1674_s20 }
  0x28   : > { %p59_p4 = scmp.ne.s32.totalorder %s1674_s20, %s1670_s19  ;;  %p60_p5 = scmp.eq.s32.totalorder %s1686_s23, 0 }
  0x29   : > { %s2065_s30 = smov (%p43_p1, %s41_s30), 0  ;;  %p1382_p9 = scmp.lt.s32.totalorder %s1686_s23, 3 }
  0x2a   : > { %p61_p8 = por %p60_p5, %p59_p4  ;;  %s45_s27 = ssub.s32 %s1682_s22, %s2065_s30 }
  0x2b   : > { %s220_s6 = sand.u32 1, %s1674_s20   ;;  %p50_p10 = scmp.eq.s32.totalorder %s45_s27, 0 }
  0x2c   : > { %s1213_s29 = sshll.u32 %s220_s6, 6  ;;  %s1255_s7 = sshll.u32 %s1682_s22, 10 }
  0x2d   : > { %s1817_s8 = scalar_select %p50_p10, %s1674_s20, %s52_s18  }
  0x2e   : > { %s1822_s28 = scalar_lea.hbm %s2039_s0, %s1255_s7  ;;  %s224_s11 = scalar_lea.vmem [#allocation7], %s1213_s29 }
  0x2f   : > { %s234_s12 = sshll.u32 %s224_s11, 4  ;;  %p1824_p7 = pnand %p1382_p9, %p61_p8  ;;  %s1828_s12 = int_to_ptr.vmem [resolvable:$true] %s234_s12 }
  0x30   : > { %s248_s16 = scalar_lea.vmem [#allocation10], %s1213_s29  ;;  %s1832_s18 = scalar_lea.sflag [#allocation8], %s220_s6 }
  0x31   : > { %s1830_s17 = sshll.u32 %s248_s16, 4  ;;  %s1538_s27 = scalar_lea.hbm %s1822_s28, 1024  ;;  %s1864_s17 = int_to_ptr.vmem [resolvable:$true] %s1830_s17 }
  0x32   : > { %p1539_p11 = scmp.ne.s32.totalorder %s1822_s28, %s1538_s27  ;;  %p1540_p12 = pneg %p1824_p7 }
  0x33   : > { %s1543_s10 = scalar_lea.hbm %s2039_s0, 3072  ;;  %p1544_p2 = scmp.lt.u32.totalorder %s1822_s28, %s2039_s0 }
  0x34   : > { %p1541_p13 = pnand %p1540_p12, %p1539_p11  ;;  %p1545_p3 = scmp.lt.u32.totalorder %s1543_s10, %s1538_s27 }
  0x35   : > { %p1547_p1 = scmp.lt.u32.totalorder %s1538_s27, %s1822_s28 }
  0x36   : > { %p1542_p0 = pneg %p1541_p13  ;;  %p1546_p6 = por %p1545_p3, %p1544_p2 }
  0x38   : > { %p1548_p4 = por %p1547_p1, %p1546_p6 }
  0x3a   : > { %p1549_p5 = pnand %p1548_p4, %p1542_p0 }
  0x3c   : > { %1552 = shalt.err (!%p1549_p5)
}
  0x3d   : > { %s1553_s6 = scalar_lea.vmem %s1828_s12, 1024  ;;  %s1691_s29 = smov [#allocation7]  }
  0x3e   : > { %p1554_p8 = scmp.ne.s32.totalorder %s1828_s12, %s1553_s6  ;;  %s1558_s16 = sshll.u32 %s1691_s29, 4  ;;  %s1559_s16 = int_to_ptr.vmem [resolvable:$false] %s1558_s16 }
  0x3f   : > { %s1560_s14 = scalar_lea.vmem %s1559_s16, 2048  ;;  %p1561_p11 = scmp.lt.s32.totalorder %s1828_s12, %s1559_s16 }
  0x40   : > { %p1556_p9 = pnand %p1554_p8, %p1540_p12  ;;  %p1562_p13 = scmp.lt.s32.totalorder %s1560_s14, %s1553_s6 }
  0x42   : > { %p1557_p10 = pneg %p1556_p9  ;;  %p1563_p2 = por %p1562_p13, %p1561_p11 }
  0x44   : > { %p1564_p3 = pnand %p1563_p2, %p1557_p10 }
  0x46   : > { %1567 = shalt.err (!%p1564_p3)
}
  0x47   : > { %s2054_s27 = smov 64   ;;  %s244_s7 = sand.u32 1, %s1686_s23  }
  0x48   : > { %1377 = dma.hbm_to_vmem [thread:$0]  (!%p1824_p7), %s1822_s28, 1024, %s1828_s12, %s1832_s18, %s2054_s27, %s2054_s27, %s1690_s15  }
  0x49   : > { %s1217_s9 = sshll.u32 %s1682_s22, 6  ;;  %s1873_s29 = scalar_lea.sflag [#allocation11], %s244_s7 }
  0x4a   : > { %s1871_s6 = scalar_lea.hbm %s2040_s1, %s1217_s9  ;;  %s1573_s18 = scalar_lea.hbm %s2040_s1, 3072 }
  0x4b   : > { %s1568_s16 = scalar_lea.hbm %s1871_s6, 1024  ;;  %p1574_p4 = scmp.lt.u32.totalorder %s1871_s6, %s2040_s1 }
  0x4c   : > { %p1569_p0 = scmp.ne.s32.totalorder %s1871_s6, %s1568_s16  ;;  %p1575_p5 = scmp.lt.u32.totalorder %s1573_s18, %s1568_s16 }
  0x4d   : > { %p1577_p9 = scmp.lt.u32.totalorder %s1568_s16, %s1871_s6 }
  0x4e   : > { %p1571_p6 = pnand %p1569_p0, %p1540_p12  ;;  %p1576_p8 = por %p1575_p5, %p1574_p4 }
  0x50   : > { %p1572_p1 = pneg %p1571_p6  ;;  %p1578_p10 = por %p1577_p9, %p1576_p8 }
  0x52   : > { %p1579_p11 = pnand %p1578_p10, %p1572_p1 }
  0x54   : > { %1582 = shalt.err (!%p1579_p11)
}
  0x55   : > { %s1583_s7 = scalar_lea.vmem %s1864_s17, 1024  ;;  %s1692_s9 = smov [#allocation10]  }
  0x56   : > { %p1584_p13 = scmp.ne.s32.totalorder %s1864_s17, %s1583_s7  ;;  %s1588_s11 = sshll.u32 %s1692_s9, 4  ;;  %s1589_s11 = int_to_ptr.vmem [resolvable:$false] %s1588_s11 }
  0x57   : > { %s1590_s28 = scalar_lea.vmem %s1589_s11, 2048  ;;  %p1591_p0 = scmp.lt.s32.totalorder %s1864_s17, %s1589_s11 }
  0x58   : > { %p1586_p2 = pnand %p1584_p13, %p1540_p12  ;;  %p1592_p6 = scmp.lt.s32.totalorder %s1590_s28, %s1583_s7 }
  0x5a   : > { %p1587_p3 = pneg %p1586_p2  ;;  %p1593_p4 = por %p1592_p6, %p1591_p0 }
  0x5c   : > { %p1594_p5 = pnand %p1593_p4, %p1587_p3 }
  0x5e   : > { %1597 = shalt.err (!%p1594_p5)
}
  0x5f   : > { %s1693_s16 = smov 192   ;;  %p2055_p12 = scmp.ne.s32.totalorder %s2051_s26, 0 }
  0x60   : > { %1380 = dma.hbm_to_vmem [thread:$0]  (!%p1824_p7), %s1871_s6, 1024, %s1864_s17, %s1873_s29, %s1693_s16, %s2054_s27, %s1690_s15  }
  0x61   : > { %269 = sbr.rel (%p2055_p12) target bundleno = 1133 (0x46d), region = 40  ;;  %s271_s12 = sand.u32 (!%p2055_p12), 1, %s1670_s19  }
  0x62   : > { %s1219_s18 = sshll.u32 (!%p2055_p12), %s271_s12, 6  ;;  %s272_s14 = scalar_lea.sflag (!%p2055_p12), [#allocation8], %s271_s12 }
  0x63   : > { %s1904_s10 = scalar_lea.vmem (!%p2055_p12), [#allocation7], %s1219_s18  ;;  %p2056_p1 = scmp.ne.s32.totalorder (!%p2055_p12), %s2050_s25, 0 }
  0x68   : > { %1649 = dma.done.wait (%p2056_p1), %s272_s14, 1024  }
  0x69   : > { %1651 = vsyncadd (%p2056_p1), %s272_s14, 4294966272  ;;  %s280_s13 = sand.u32 1, %s1761_s24   ;;  %s1911_s15 = scalar_lea.vmem [#allocation10], %s1219_s18 }
  0x6a   : > { %s281_s7 = scalar_lea.sflag [#allocation11], %s280_s13 }
  0x6b   : > { %1653 = dma.done.wait (%p2056_p1), %s281_s7, 1024  }
  0x6c   : > { %1655 = vsyncadd (%p2056_p1), %s281_s7, 4294966272  ;;  %p2057_p7 = scmp.eq.s32.totalorder %s1761_s24, 0 }
  0x6e   : > { %1657 = dma.done.wait (%p2057_p7), [#allocation11], 1024   ;;  %p2058_p8 = pmov %p2057_p7 }
  0x6f   : > { %p318_p9 = scmp.eq.s32.totalorder %s1678_s21, 0 }
  0x70   : > { %1659 = vsyncadd (%p2058_p8), [#allocation11], 4294966272  ;;  %vm343_vm0 = vcmask (%p318_p9), 0   ;;  %v1694_v0 = vmov (%p318_p9), 0.0   ;;  %v1695_v1 = vmov (%p318_p9), -inf  }
  0x71   : > { %326 = sbr.rel (!%p318_p9) target bundleno = 122 (0x7a), region = 56  ;;  %327 = vst [vmem:[#allocation13] sm:$0xff] (%p318_p9), %v1694_v0  ;;  %328 = vst [vmem:[#allocation13 + $0x8] sm:$0xff] (%p318_p9), %v1694_v0 }
  0x72   : > { %329 = vst [vmem:[#allocation13 + $0x10] sm:$0xff] (%p318_p9), %v1694_v0  ;;  %330 = vst [vmem:[#allocation13 + $0x18] sm:$0xff] (%p318_p9), %v1694_v0 }
  0x73   : > { %331 = vst [vmem:[#allocation13 + $0x20] sm:$0xff] (%p318_p9), %v1694_v0  ;;  %332 = vst [vmem:[#allocation13 + $0x28] sm:$0xff] (%p318_p9), %v1694_v0 }
  0x74   : > { %333 = vst [vmem:[#allocation13 + $0x30] sm:$0xff] (%p318_p9), %v1694_v0  ;;  %334 = vst [vmem:[#allocation13 + $0x38] sm:$0xff] (%p318_p9), %v1694_v0 }
  0x75   : > { %335 = vst [vmem:[#allocation13 + $0x40] sm:$0xff] (%p318_p9), %v1694_v0  ;;  %336 = vst [vmem:[#allocation13 + $0x48] sm:$0xff] (%p318_p9), %v1694_v0 }
  0x76   : > { %337 = vst [vmem:[#allocation13 + $0x50] sm:$0xff] (%p318_p9), %v1694_v0  ;;  %338 = vst [vmem:[#allocation13 + $0x58] sm:$0xff] (%p318_p9), %v1694_v0 }
  0x77   : > { %339 = vst [vmem:[#allocation13 + $0x60] sm:$0xff] (%p318_p9), %v1694_v0  ;;  %340 = vst [vmem:[#allocation13 + $0x68] sm:$0xff] (%p318_p9), %v1694_v0 }
  0x78   : > { %341 = vst [vmem:[#allocation13 + $0x70] sm:$0xff] %v1694_v0  ;;  %342 = vst [vmem:[#allocation13 + $0x78] sm:$0xff] %v1694_v0 }
  0x79   : > { %344 = vst.msk [vmem:[#allocation5] sm:$0x1] %vm343_vm0, %v1695_v1  ;;  %345 = vst.msk [vmem:[#allocation6] sm:$0x1] %vm343_vm0, %v1694_v0 }
  0x7a PF: > { %v1447_v2 = vld [vmem:[%s1911_s15] sm:$0xff]   ;;  %v1448_v3 = vld [vmem:[%s1911_s15 + $0x8] sm:$0xff]   ;;  %v1449_v4 = vld [vmem:[%s1911_s15 + $0x10] sm:$0xff]   ;;  %v1696_v50 = vmov 0.0   ;;  %vm896_vm1 = vcmask 1040384   ;;  %vm1029_vm2 = vcmask 0  }
  0x7b   : > { %1292 = vmatprep.subr.bf16.mxu0 %v1447_v2  ;;  %v1450_v5 = vld [vmem:[%s1911_s15 + $0x18] sm:$0xff]   ;;  %v1455_v6 = vld [vmem:[%s1904_s10] sm:$0xff]   ;;  %v1452_v8 = vld [vmem:[%s1911_s15 + $0x28] sm:$0xff]   ;;  %350 = vst [vmem:[#allocation4] sm:$0x1] %v1696_v50  ;;  %p1032_p10 = scmp.eq.s32.totalorder %s1678_s21, 2 }
  0x7c   : > { %1293 = vmatpush3.bf16.msra.mxu0 %v1447_v2  ;;  %1308 = vmatprep.mubr.bf16.mxu0 %v1455_v6  ;;  %v1451_v7 = vld [vmem:[%s1911_s15 + $0x20] sm:$0xff]   ;;  %v1464_v10 = vld [vmem:[#allocation12 + $0x8] sm:$0xff]   ;;  %v1453_v11 = vld [vmem:[%s1911_s15 + $0x30] sm:$0xff]  }
  0x7d   : > { %1294 = vmatprep.subr.bf16.mxu0 %v1448_v3  ;;  %v1463_v9 = vld [vmem:[#allocation12] sm:$0xff]   ;;  %v1465_v12 = vld [vmem:[#allocation12 + $0x10] sm:$0xff]   ;;  %v1454_v13 = vld [vmem:[%s1911_s15 + $0x38] sm:$0xff]  }
  0x7e   : > { %1324 = vmatprep.subr.bf16.mxu1 %v1463_v9  ;;  %v1466_v14 = vld [vmem:[#allocation12 + $0x18] sm:$0xff]   ;;  %v1467_v15 = vld [vmem:[#allocation12 + $0x20] sm:$0xff]   ;;  %v1456_v16 = vld [vmem:[%s1904_s10 + $0x8] sm:$0xff]  }
  0x7f   : > { %1325 = vmatpush3.bf16.msra.mxu1 %v1463_v9  ;;  %v1457_v17 = vld [vmem:[%s1904_s10 + $0x10] sm:$0xff]   ;;  %v1468_v18 = vld [vmem:[#allocation12 + $0x28] sm:$0xff]   ;;  %v1458_v20 = vld [vmem:[%s1904_s10 + $0x18] sm:$0xff]  }
  0x80   : > { %1295 = vmatpush3.bf16.msra.mxu0 %v1448_v3  ;;  %1326 = vmatprep.subr.bf16.mxu1 %v1464_v10  ;;  %v1469_v19 = vld [vmem:[#allocation12 + $0x30] sm:$0xff]   ;;  %v1459_v21 = vld [vmem:[%s1904_s10 + $0x20] sm:$0xff]   ;;  %v1460_v22 = vld [vmem:[%s1904_s10 + $0x28] sm:$0xff]  }
  0x81   : > { %1296 = vmatprep.subr.bf16.mxu0 %v1449_v4  ;;  %v1461_v23 = vld [vmem:[%s1904_s10 + $0x30] sm:$0xff]   ;;  %v1462_v24 = vld [vmem:[%s1904_s10 + $0x38] sm:$0xff]  }
  0x82   : > { %v1470_v25 = vld [vmem:[#allocation12 + $0x38] sm:$0xff]  }
  0x83   : > { %1327 = vmatpush3.bf16.msra.mxu1 %v1464_v10  ;;  %v1240_v51 = vld [vmem:[%s2042_s3] ss:$0 sm:$0xff] }
  0x84   : > { %1297 = vmatpush3.bf16.msra.mxu0 %v1449_v4  ;;  %1328 = vmatprep.subr.bf16.mxu1 %v1465_v12 }
  0x85   : > { %1298 = vmatprep.subr.bf16.mxu0 %v1450_v5 }
  0x87   : > { %1329 = vmatpush3.bf16.msra.mxu1 %v1465_v12 }
  0x88   : > { %1299 = vmatpush3.bf16.msra.mxu0 %v1450_v5  ;;  %1330 = vmatprep.subr.bf16.mxu1 %v1466_v14 }
  0x89   : > { %1300 = vmatprep.subr.bf16.mxu0 %v1451_v7 }
  0x8b   : > { %1331 = vmatpush3.bf16.msra.mxu1 %v1466_v14 }
  0x8c   : > { %1301 = vmatpush3.bf16.msra.mxu0 %v1451_v7  ;;  %1332 = vmatprep.subr.bf16.mxu1 %v1467_v15 }
  0x8d   : > { %1302 = vmatprep.subr.bf16.mxu0 %v1452_v8 }
  0x8f   : > { %1333 = vmatpush3.bf16.msra.mxu1 %v1467_v15 }
  0x90   : > { %1303 = vmatpush3.bf16.msra.mxu0 %v1452_v8  ;;  %1334 = vmatprep.subr.bf16.mxu1 %v1468_v18 }
  0x91   : > { %1304 = vmatprep.subr.bf16.mxu0 %v1453_v11 }
  0x93   : > { %1335 = vmatpush3.bf16.msra.mxu1 %v1468_v18 }
  0x94   : > { %1305 = vmatpush3.bf16.msra.mxu0 %v1453_v11  ;;  %1336 = vmatprep.subr.bf16.mxu1 %v1469_v19 }
  0x95   : > { %1306 = vmatprep.subr.bf16.mxu0 %v1454_v13 }
  0x97   : > { %1337 = vmatpush3.bf16.msra.mxu1 %v1469_v19 }
  0x98   : > { %1307 = vmatpush3.bf16.msra.mxu0 %v1454_v13  ;;  %1338 = vmatprep.subr.bf16.mxu1 %v1470_v25 }
  0x9b   : > { %1309 = vmatmul.mubr.bf16.vlgmr.msra.gmra.mrb[0].mxu0 %v1456_v16  ;;  %1339 = vmatpush3.bf16.msra.mxu1 %v1470_v25 }
  0x9c   : > { %1312 = vmatprep.mubr.bf16.mxu0 %v1457_v17 }
  0xa3   : > { %1313 = vmatmul.mubr.bf16.gmra.mrb[4].mxu0 %v1458_v20 }
  0xa4   : > { %1316 = vmatprep.mubr.bf16.mxu0 %v1459_v21 }
  0xab   : > { %1317 = vmatmul.mubr.bf16.gmra.mrb[8].mxu0 %v1460_v22 }
  0xac   : > { %1320 = vmatprep.mubr.bf16.mxu0 %v1461_v23 }
  0xb3   : > { %1321 = vmatmul.mubr.bf16.gmra.mrb[12].mxu0 %v1462_v24 }
 0x16e   : > { %v1310_v26 = vpop.f32.mrb[0].mxu0 }
 0x16f   : > { %v548_v27 = vpop.f32.mrb[1].mxu0 }
 0x170   : > { %v1311_v28 = vpop.f32.mrb[2].mxu0 }
 0x171   : > { %v1940_v29 = vpack.c.bf16 %v1311_v28, %v1310_v26  ;;  %v551_v30 = vpop.f32.mrb[3].mxu0 }
 0x172   : > { %v1942_v31 = vpack.c.bf16 %v551_v30, %v548_v27 }
 0x174   : > { %1340 = vmatprep.mubr.bf16.mxu1 %v1942_v31 }
 0x175   : > { %1341 = vmatmul.mubr.bf16.vlgmr.msra.gmra.mrb[0].mxu1 %v1940_v29 }
 0x176   : > { %v1314_v32 = vpop.f32.mrb[4].mxu0 }
 0x177   : > { %v564_v33 = vpop.f32.mrb[5].mxu0 }
 0x178   : > { %v1315_v34 = vpop.f32.mrb[6].mxu0 }
 0x179   : > { %v1946_v35 = vpack.c.bf16 %v1315_v34, %v1314_v32  ;;  %v567_v36 = vpop.f32.mrb[7].mxu0 }
 0x17a   : > { %v1948_v37 = vpack.c.bf16 %v567_v36, %v564_v33 }
 0x17c   : > { %1344 = vmatprep.mubr.bf16.mxu1 %v1948_v37 }
 0x17d   : > { %1345 = vmatmul.mubr.bf16.gmra.mrb[4].mxu1 %v1946_v35 }
 0x17e   : > { %v1318_v38 = vpop.f32.mrb[8].mxu0 }
 0x17f   : > { %v580_v39 = vpop.f32.mrb[9].mxu0 }
 0x180   : > { %v1319_v40 = vpop.f32.mrb[10].mxu0 }
 0x181   : > { %v1952_v41 = vpack.c.bf16 %v1319_v40, %v1318_v38  ;;  %v583_v42 = vpop.f32.mrb[11].mxu0 }
 0x182   : > { %v1954_v43 = vpack.c.bf16 %v583_v42, %v580_v39 }
 0x184   : > { %1348 = vmatprep.mubr.bf16.mxu1 %v1954_v43 }
 0x185   : > { %1349 = vmatmul.mubr.bf16.gmra.mrb[8].mxu1 %v1952_v41 }
 0x186   : > { %v1322_v44 = vpop.f32.mrb[12].mxu0 }
 0x187   : > { %v596_v45 = vpop.f32.mrb[13].mxu0 }
 0x188   : > { %v1323_v46 = vpop.f32.mrb[14].mxu0 }
 0x189   : > { %v1958_v47 = vpack.c.bf16 %v1323_v46, %v1322_v44  ;;  %v599_v48 = vpop.f32.mrb[15].mxu0 }
 0x18a   : > { %v1960_v49 = vpack.c.bf16 %v599_v48, %v596_v45 }
 0x18c   : > { %1352 = vmatprep.mubr.bf16.mxu1 %v1960_v49 }
 0x18d   : > { %1353 = vmatmul.mubr.bf16.gmra.mrb[12].mxu1 %v1958_v47 }
 0x248   : > { %v1342_v52 = vpop.f32.mrb[0].mxu1 }
 0x249   : > { %v788_v53 = vpop.f32.mrb[1].mxu1  ;;  %v797_v57 = vadd.f32 %v1342_v52, %v1240_v51 }
 0x24a   : > { %v789_v54 = vadd.f32 %v1240_v51, %v788_v53  ;;  %v1343_v55 = vpop.f32.mrb[2].mxu1 }
 0x24b   : > { %v791_v56 = vpop.f32.mrb[3].mxu1  ;;  %v800_v59 = vadd.f32 %v1343_v55, %v1240_v51 }
 0x24c   : > { %v792_v58 = vadd.f32 %v1240_v51, %v791_v56  ;;  %1471 = vtanh.f32 %v789_v54 }
 0x24e   : > { %1473 = vtanh.f32 %v792_v58 }
 0x24f   : > { %1475 = vtanh.f32 %v797_v57 }
 0x250   : > { %v1346_v60 = vpop.f32.mrb[4].mxu1  ;;  %1477 = vtanh.f32 %v800_v59 }
 0x251   : > { %v804_v61 = vpop.f32.mrb[5].mxu1  ;;  %v813_v1 = vadd.f32 %v1346_v60, %v1240_v51 }
 0x252   : > { %v805_v62 = vadd.f32 %v1240_v51, %v804_v61  ;;  %v1347_v63 = vpop.f32.mrb[6].mxu1 }
 0x253   : > { %v807_v0 = vpop.f32.mrb[7].mxu1  ;;  %v816_v3 = vadd.f32 %v1347_v63, %v1240_v51 }
 0x254   : > { %1479 = vtanh.f32 %v805_v62  ;;  %v808_v2 = vadd.f32 %v1240_v51, %v807_v0  ;;  %v867_v0 = vld [vmem:[#allocation4] sm:$0x1] }
 0x256   : > { %1481 = vtanh.f32 %v808_v2  ;;  %v1472_v4 = vpop.eup %1471 }
 0x257   : > { %1483 = vtanh.f32 %v813_v1 }
 0x258   : > { %v1474_v5 = vpop.eup %1473  ;;  %v1350_v6 = vpop.f32.mrb[8].mxu1  ;;  %1485 = vtanh.f32 %v816_v3  ;;  %v894_v3 = vld [vmem:[%s2043_s4] sm:$0x1] }
 0x259   : > { %v868_v7 = vadd.f32 %v1474_v5, %v1472_v4  ;;  %v820_v8 = vpop.f32.mrb[9].mxu1  ;;  %v1476_v9 = vpop.eup %1475  ;;  %v829_v15 = vadd.f32 %v1350_v6, %v1240_v51 }
 0x25a   : > { %v821_v10 = vadd.f32 %v1240_v51, %v820_v8  ;;  %v1351_v11 = vpop.f32.mrb[10].mxu1  ;;  %v1478_v14 = vpop.eup %1477  ;;  %v901_v8 = vld [vmem:[#allocation5] sm:$0x1] }
 0x25b   : > { %v869_v12 = vadd.f32 %v1476_v9, %v868_v7  ;;  %v823_v13 = vpop.f32.mrb[11].mxu1  ;;  %v832_v19 = vadd.f32 %v1351_v11, %v1240_v51  ;;  %v1697_v7 = vmov 0  }
 0x25c   : > { %1487 = vtanh.f32 %v821_v10  ;;  %v824_v16 = vadd.f32 %v1240_v51, %v823_v13  ;;  %1446 = vset.pattern.permute.xlu0 %v1697_v7 }
 0x25d   : > { %v870_v17 = vadd.f32 %v1478_v14, %v869_v12 }
 0x25e   : > { %v1480_v18 = vpop.eup %1479  ;;  %1489 = vtanh.f32 %v824_v16  ;;  %v926_v16 = vlaneseq }
 0x25f   : > { %v871_v20 = vadd.f32 %v1480_v18, %v870_v17  ;;  %1491 = vtanh.f32 %v829_v15 }
 0x260   : > { %v1482_v21 = vpop.eup %1481  ;;  %v1354_v22 = vpop.f32.mrb[12].mxu1  ;;  %1493 = vtanh.f32 %v832_v19  ;;  %v1971_v17 = vshrl.u32 %v926_v16, 7  ;;  %v1026_v19 = vld [vmem:[#allocation6] sm:$0x1] }
 0x261   : > { %v872_v23 = vadd.f32 %v1482_v21, %v871_v20  ;;  %v836_v24 = vpop.f32.mrb[13].mxu1  ;;  %v1484_v25 = vpop.eup %1483  ;;  %v845_v33 = vadd.f32 %v1354_v22, %v1240_v51 }
 0x262   : > { %v837_v26 = vadd.f32 %v1240_v51, %v836_v24  ;;  %v1355_v27 = vpop.f32.mrb[14].mxu1  ;;  %v1486_v32 = vpop.eup %1485  ;;  %v928_v18 = vsub.s32 0, %v1971_v17 }
 0x263   : > { %v873_v28 = vadd.f32 %v1484_v25, %v872_v23  ;;  %v839_v30 = vpop.f32.mrb[15].mxu1  ;;  %v848_v39 = vadd.f32 %v1355_v27, %v1240_v51  ;;  %v960_v25 = vunpack.c.l.bf16 %v1940_v29  ;;  %v958_v27 = vunpack.c.l.bf16 %v1942_v31 }
 0x264   : > { %1495 = vtanh.f32 %v837_v26  ;;  %v840_v34 = vadd.f32 %v1240_v51, %v839_v30  ;;  %v961_v26 = vunpack.c.h.bf16 %v1940_v29  ;;  %v964_v30 = vunpack.c.l.bf16 %v1946_v35 }
 0x265   : > { %v874_v36 = vadd.f32 %v1486_v32, %v873_v28  ;;  %v959_v28 = vunpack.c.h.bf16 %v1942_v31  ;;  %v965_v32 = vunpack.c.h.bf16 %v1946_v35  ;;  %v967_v29 = vunpack.c.h.bf16 %v1954_v43 }
 0x266   : > { %v1488_v38 = vpop.eup %1487  ;;  %1497 = vtanh.f32 %v840_v34  ;;  %v963_v34 = vunpack.c.h.bf16 %v1948_v37  ;;  %v973_v31 = vunpack.c.h.bf16 %v1958_v47  ;;  %v971_v35 = vunpack.c.h.bf16 %v1960_v49 }
 0x267   : > { %v875_v40 = vadd.f32 %v1488_v38, %v874_v36  ;;  %1499 = vtanh.f32 %v845_v33  ;;  %v962_v33 = vunpack.c.l.bf16 %v1948_v37  ;;  %v968_v38 = vunpack.c.l.bf16 %v1952_v41 }
 0x268   : > { %v1490_v42 = vpop.eup %1489  ;;  %1501 = vtanh.f32 %v848_v39  ;;  %v969_v39 = vunpack.c.h.bf16 %v1952_v41  ;;  %v912_v41 = vld [vmem:[#allocation13 + $0x18] sm:$0xff] }
 0x269   : > { %v876_v44 = vadd.f32 %v1490_v42, %v875_v40  ;;  %v1492_v45 = vpop.eup %1491  ;;  %v966_v40 = vunpack.c.l.bf16 %v1954_v43  ;;  %v972_v42 = vunpack.c.l.bf16 %v1958_v47 }
 0x26a   : > { %v1494_v48 = vpop.eup %1493 }
 0x26b   : > { %v877_v46 = vadd.f32 %v1492_v45, %v876_v44  ;;  %v970_v44 = vunpack.c.l.bf16 %v1960_v49  ;;  %v909_v45 = vld [vmem:[#allocation13] sm:$0xff]  ;;  %v916_v49 = vld [vmem:[#allocation13 + $0x38] sm:$0xff] }
 0x26d   : > { %v878_v50 = vadd.f32 %v1494_v48, %v877_v46 }
 0x26e   : > { %v1496_v52 = vpop.eup %1495 }
 0x26f   : > { %v879_v53 = vadd.f32 %v1496_v52, %v878_v50  ;;  %v910_v52 = vld [vmem:[#allocation13 + $0x8] sm:$0xff] }
 0x270   : > { %v1498_v54 = vpop.eup %1497 }
 0x271   : > { %v880_v55 = vadd.f32 %v1498_v54, %v879_v53  ;;  %v1500_v56 = vpop.eup %1499  ;;  %v911_v53 = vld [vmem:[#allocation13 + $0x10] sm:$0xff] }
 0x272   : > { %v1502_v58 = vpop.eup %1501 }
 0x273   : > { %v881_v57 = vadd.f32 %v1500_v56, %v880_v55 }
 0x275   : > { %v882_v59 = vadd.f32 %v1502_v58, %v881_v57  ;;  %v913_v57 = vld [vmem:[#allocation13 + $0x20] sm:$0xff]  ;;  %v914_v58 = vld [vmem:[#allocation13 + $0x28] sm:$0xff] }
 0x277   : > { %v883_v60 = vrot.slane %v882_v59, 4 }
 0x279   : > { %v884_v51 = vadd.f32 %v883_v60, %v882_v59  ;;  %v915_v59 = vld [vmem:[#allocation13 + $0x30] sm:$0xff] }
 0x27b   : > { %v885_v61 = vrot.slane %v884_v51, 2 }
 0x27d   : > { %v886_v62 = vadd.f32 %v885_v61, %v884_v51 }
 0x27f   : > { %v887_v63 = vrot.slane %v886_v62, 1 }
 0x281   : > { %v888_v1 = vadd.f32 %v887_v63, %v886_v62  ;;  %v917_v62 = vld [vmem:[#allocation13 + $0x40] sm:$0xff]  ;;  %v918_v63 = vld [vmem:[#allocation13 + $0x48] sm:$0xff] }
 0x283   : > { %v889_v2 = vadd.f32 %v888_v1, %v867_v0 }
 0x285   : > { %890 = vst [vmem:[#allocation4] sm:$0x1] %v889_v2 }
 0x28c   : > { %v893_v4 = vld [vmem:[#allocation4] sm:$0x1] }
 0x28d   : > { %v895_v5 = vmul.f32 %v894_v3, %v893_v4  ;;  %v919_v4 = vld [vmem:[#allocation13 + $0x50] sm:$0xff] }
 0x28f   : > { %v897_v6 = vsel %vm896_vm1, %v895_v5, 0.0  ;;  %v920_v5 = vld [vmem:[#allocation13 + $0x58] sm:$0xff] }
 0x290   : > { %898 = vadd.xlane.f32.xlu0 %v897_v6  ;;  %v921_v6 = vld [vmem:[#allocation13 + $0x60] sm:$0xff] }
 0x31d   : > { %v899_v9 = vpop.xlane.xlu0 %898 }
 0x31e   : > { %v900_v10 = vmul.f32 0.0078125, %v899_v9  ;;  %v923_v9 = vld [vmem:[#allocation13 + $0x70] sm:$0xff] }
 0x320   : > { %v902_v11 = vmax.f32 %v901_v8, %v900_v10 }
 0x322   : > { %v903_v12 = vsub.f32 %v901_v8, %v902_v11  ;;  %v906_v13 = vsub.f32 %v900_v10, %v902_v11  ;;  %1031 = vst.msk [vmem:[#allocation5] sm:$0x1] %vm1029_vm2, %v902_v11  ;;  %v922_v8 = vld [vmem:[#allocation13 + $0x68] sm:$0xff]  ;;  %v924_v10 = vld [vmem:[#allocation13 + $0x78] sm:$0xff] }
 0x324   : > { %v904_v14 = vmul.f32 1.442695, %v903_v12  ;;  %v907_v15 = vmul.f32 1.442695, %v906_v13 }
 0x326   : > { %1503 = vpow2.f32 %v904_v14 }
 0x327   : > { %1505 = vpow2.f32 %v907_v15 }
 0x330   : > { %v1504_v20 = vpop.eup %1503 }
 0x331   : > { %v1506_v21 = vpop.eup %1505  ;;  %v1027_v22 = vmul.f32 %v1504_v20, %v1026_v19  ;;  %v929_v23 = vrot.slane %v1504_v20, %v928_v18 }
 0x332   : > { %1356 = vpush %v1506_v21 }
 0x333   : > { %v1028_v24 = vadd.f32 %v1506_v21, %v1027_v22  ;;  %931 = vperm.xlu0 %1446, %v929_v23  }
 0x335   : > { %1030 = vst.msk [vmem:[#allocation6] sm:$0x1] %vm1029_vm2, %v1028_v24 }
 0x363   : > { %s1357_s6 = spop %1356 }
 0x364   : > { %v976_v36 = vstv %s1357_s6 }
 0x365   : > { %v978_v46 = vmul.f32 %v976_v36, %v958_v27  ;;  %v979_v37 = vmul.f32 %v976_v36, %v959_v28  ;;  %v980_v48 = vmul.f32 %v976_v36, %v960_v25  ;;  %v981_v50 = vmul.f32 %v976_v36, %v961_v26 }
 0x366   : > { %v982_v54 = vmul.f32 %v976_v36, %v962_v33  ;;  %v983_v55 = vmul.f32 %v976_v36, %v963_v34  ;;  %v984_v56 = vmul.f32 %v976_v36, %v964_v30  ;;  %v985_v43 = vmul.f32 %v976_v36, %v965_v32 }
 0x367   : > { %v986_v47 = vmul.f32 %v976_v36, %v966_v40  ;;  %v987_v60 = vmul.f32 %v976_v36, %v967_v29  ;;  %v988_v51 = vmul.f32 %v976_v36, %v968_v38  ;;  %v989_v61 = vmul.f32 %v976_v36, %v969_v39 }
 0x368   : > { %v990_v0 = vmul.f32 %v976_v36, %v970_v44  ;;  %v991_v1 = vmul.f32 %v976_v36, %v971_v35  ;;  %v992_v2 = vmul.f32 %v976_v36, %v972_v42  ;;  %v993_v3 = vmul.f32 %v976_v36, %v973_v31 }
 0x3b2   : > { %v932_v7 = vpop.permute.xlu0 %931 }
 0x3b3   : > { %v934_v11 = vmul.f32 %v932_v7, %v909_v45  ;;  %v935_v12 = vmul.f32 %v932_v7, %v910_v52  ;;  %v936_v13 = vmul.f32 %v932_v7, %v911_v53  ;;  %v937_v14 = vmul.f32 %v932_v7, %v912_v41 }
 0x3b4   : > { %v938_v15 = vmul.f32 %v932_v7, %v913_v57  ;;  %v939_v16 = vmul.f32 %v932_v7, %v914_v58  ;;  %v940_v19 = vmul.f32 %v932_v7, %v915_v59  ;;  %v941_v20 = vmul.f32 %v932_v7, %v916_v49 }
 0x3b5   : > { %v942_v21 = vmul.f32 %v932_v7, %v917_v62  ;;  %v943_v22 = vmul.f32 %v932_v7, %v918_v63  ;;  %v944_v23 = vmul.f32 %v932_v7, %v919_v4  ;;  %v945_v24 = vmul.f32 %v932_v7, %v920_v5 }
 0x3b6   : > { %v946_v25 = vmul.f32 %v932_v7, %v921_v6  ;;  %v947_v26 = vmul.f32 %v932_v7, %v922_v8  ;;  %v948_v27 = vmul.f32 %v932_v7, %v923_v9  ;;  %v949_v28 = vmul.f32 %v932_v7, %v924_v10 }
 0x3b7   : > { %v994_v30 = vadd.f32 %v978_v46, %v934_v11  ;;  %v995_v32 = vadd.f32 %v979_v37, %v935_v12  ;;  %v996_v33 = vadd.f32 %v980_v48, %v936_v13  ;;  %v997_v34 = vadd.f32 %v981_v50, %v937_v14  ;;  %v1055_v46 = vld [vmem:[#allocation6] sm:$0x1] (%p1032_p10) }
 0x3b8   : > { %v998_v36 = vadd.f32 %v982_v54, %v938_v15  ;;  %v999_v38 = vadd.f32 %v983_v55, %v939_v16  ;;  %v1000_v39 = vadd.f32 %v984_v56, %v940_v19  ;;  %v1001_v40 = vadd.f32 %v985_v43, %v941_v20 }
 0x3b9   : > { %v1002_v29 = vadd.f32 %v986_v47, %v942_v21  ;;  %v1003_v42 = vadd.f32 %v987_v60, %v943_v22  ;;  %v1004_v31 = vadd.f32 %v988_v51, %v944_v23  ;;  %v1005_v44 = vadd.f32 %v989_v61, %v945_v24  ;;  %1010 = vst [vmem:[#allocation13] sm:$0xff] %v994_v30 }
 0x3ba   : > { %1011 = vst [vmem:[#allocation13 + $0x8] sm:$0xff] %v995_v32  ;;  %1012 = vst [vmem:[#allocation13 + $0x10] sm:$0xff] %v996_v33  ;;  %v1006_v35 = vadd.f32 %v990_v0, %v946_v25  ;;  %v1007_v45 = vadd.f32 %v991_v1, %v947_v26  ;;  %v1008_v52 = vadd.f32 %v992_v2, %v948_v27  ;;  %v1698_v37 = vmov (%p1032_p10), 0  }
 0x3bb   : > { %1013 = vst [vmem:[#allocation13 + $0x18] sm:$0xff] %v997_v34  ;;  %v1009_v53 = vadd.f32 %v993_v3, %v949_v28  ;;  %1014 = vst [vmem:[#allocation13 + $0x20] sm:$0xff] %v998_v36  ;;  %1038 = sbr.rel (!%p1032_p10) target bundleno = 1107 (0x453), region = 76  ;;  %1507 = vset.pattern.permute.xlu0 (%p1032_p10), %v1698_v37  ;;  %1508 = vrcp.f32 (%p1032_p10), %v1055_v46 }
 0x3bc   : > { %1015 = vst [vmem:[#allocation13 + $0x28] sm:$0xff] %v999_v38  ;;  %1016 = vst [vmem:[#allocation13 + $0x30] sm:$0xff] %v1000_v39 }
 0x3bd   : > { %1017 = vst [vmem:[#allocation13 + $0x38] sm:$0xff] %v1001_v40  ;;  %1018 = vst [vmem:[#allocation13 + $0x40] sm:$0xff] %v1002_v29 }
 0x3be   : > { %1019 = vst [vmem:[#allocation13 + $0x48] sm:$0xff] %v1003_v42  ;;  %1020 = vst [vmem:[#allocation13 + $0x50] sm:$0xff] %v1004_v31 }
 0x3bf   : > { %1021 = vst [vmem:[#allocation13 + $0x58] sm:$0xff] %v1005_v44  ;;  %1022 = vst [vmem:[#allocation13 + $0x60] sm:$0xff] %v1006_v35 }
 0x3c0   : > { %1023 = vst [vmem:[#allocation13 + $0x68] sm:$0xff] %v1007_v45  ;;  %1024 = vst [vmem:[#allocation13 + $0x70] sm:$0xff] %v1008_v52  ;;  %v1039_v41 = vld [vmem:[#allocation13] sm:$0xff] (%p1032_p10) }
 0x3c1   : > { %1025 = vst [vmem:[#allocation13 + $0x78] sm:$0xff] %v1009_v53  ;;  %v1040_v54 = vld [vmem:[#allocation13 + $0x8] sm:$0xff] (%p1032_p10)  ;;  %v1041_v55 = vld [vmem:[#allocation13 + $0x10] sm:$0xff] (%p1032_p10) }
 0x3c2   : > { %v1042_v56 = vld [vmem:[#allocation13 + $0x18] sm:$0xff]  ;;  %v1043_v43 = vld [vmem:[#allocation13 + $0x20] sm:$0xff] }
 0x3c3   : > { %v1044_v57 = vld [vmem:[#allocation13 + $0x28] sm:$0xff]  ;;  %v1045_v58 = vld [vmem:[#allocation13 + $0x30] sm:$0xff] }
 0x3c4   : > { %v1046_v59 = vld [vmem:[#allocation13 + $0x38] sm:$0xff]  ;;  %v1047_v47 = vld [vmem:[#allocation13 + $0x40] sm:$0xff] }
 0x3c5   : > { %v1509_v48 = vpop.eup %1508  ;;  %v1048_v60 = vld [vmem:[#allocation13 + $0x48] sm:$0xff]  ;;  %v1049_v61 = vld [vmem:[#allocation13 + $0x50] sm:$0xff] }
 0x3c6   : > { %v1061_v50 = vrot.slane %v1509_v48, %v928_v18  ;;  %v1050_v49 = vld [vmem:[#allocation13 + $0x58] sm:$0xff]  ;;  %v1051_v62 = vld [vmem:[#allocation13 + $0x60] sm:$0xff] }
 0x3c7   : > { %v1052_v63 = vld [vmem:[#allocation13 + $0x68] sm:$0xff]  ;;  %v1053_v0 = vld [vmem:[#allocation13 + $0x70] sm:$0xff] }
 0x3c8   : > { %1063 = vperm.xlu0 %1507, %v1061_v50   ;;  %v1054_v1 = vld [vmem:[#allocation13 + $0x78] sm:$0xff] }
 0x447   : > { %v1064_v51 = vpop.permute.xlu0 %1063 }
 0x448   : > { %v1066_v17 = vmul.f32 %v1064_v51, %v1039_v41  ;;  %v1067_v18 = vmul.f32 %v1064_v51, %v1040_v54  ;;  %v1068_v2 = vmul.f32 %v1064_v51, %v1041_v55  ;;  %v1069_v3 = vmul.f32 %v1064_v51, %v1042_v56 }
 0x449   : > { %v1070_v4 = vmul.f32 %v1064_v51, %v1043_v43  ;;  %v1071_v5 = vmul.f32 %v1064_v51, %v1044_v57  ;;  %v1072_v6 = vmul.f32 %v1064_v51, %v1045_v58  ;;  %v1073_v7 = vmul.f32 %v1064_v51, %v1046_v59 }
 0x44a   : > { %v1074_v8 = vmul.f32 %v1064_v51, %v1047_v47  ;;  %v1075_v9 = vmul.f32 %v1064_v51, %v1048_v60  ;;  %v1076_v10 = vmul.f32 %v1064_v51, %v1049_v61  ;;  %v1077_v11 = vmul.f32 %v1064_v51, %v1050_v49  ;;  %1082 = vst [vmem:[#allocation13] sm:$0xff] %v1066_v17 }
 0x44b   : > { %1083 = vst [vmem:[#allocation13 + $0x8] sm:$0xff] %v1067_v18  ;;  %1084 = vst [vmem:[#allocation13 + $0x10] sm:$0xff] %v1068_v2  ;;  %v1078_v12 = vmul.f32 %v1064_v51, %v1051_v62  ;;  %v1079_v13 = vmul.f32 %v1064_v51, %v1052_v63  ;;  %v1080_v14 = vmul.f32 %v1064_v51, %v1053_v0 }
 0x44c   : > { %1085 = vst [vmem:[#allocation13 + $0x18] sm:$0xff] %v1069_v3  ;;  %v1081_v15 = vmul.f32 %v1064_v51, %v1054_v1  ;;  %1086 = vst [vmem:[#allocation13 + $0x20] sm:$0xff] %v1070_v4 }
 0x44d   : > { %1087 = vst [vmem:[#allocation13 + $0x28] sm:$0xff] %v1071_v5  ;;  %1088 = vst [vmem:[#allocation13 + $0x30] sm:$0xff] %v1072_v6 }
 0x44e   : > { %1089 = vst [vmem:[#allocation13 + $0x38] sm:$0xff] %v1073_v7  ;;  %1090 = vst [vmem:[#allocation13 + $0x40] sm:$0xff] %v1074_v8 }
 0x44f   : > { %1091 = vst [vmem:[#allocation13 + $0x48] sm:$0xff] %v1075_v9  ;;  %1092 = vst [vmem:[#allocation13 + $0x50] sm:$0xff] %v1076_v10 }
 0x450   : > { %1093 = vst [vmem:[#allocation13 + $0x58] sm:$0xff] %v1077_v11  ;;  %1094 = vst [vmem:[#allocation13 + $0x60] sm:$0xff] %v1078_v12 }
 0x451   : > { %1095 = vst [vmem:[#allocation13 + $0x68] sm:$0xff] %v1079_v13  ;;  %1096 = vst [vmem:[#allocation13 + $0x70] sm:$0xff] %v1080_v14 }
 0x452   : > { %1097 = vst [vmem:[#allocation13 + $0x78] sm:$0xff] %v1081_v15 }
 0x453 PF: > { %p1384_p11 = scmp.eq.s32.totalorder %s1761_s24, 2  ;;  %s1699_s21 = smov [#allocation13]  }
 0x454   : > { %s1104_s29 = sshll.u32 %s1699_s21, 4  ;;  %s1105_s29 = int_to_ptr.vmem [resolvable:$true] %s1104_s29 }
 0x455   : > { %s1598_s9 = scalar_lea.vmem %s1105_s29, 2048  ;;  %p1605_p0 = scmp.lt.s32.totalorder %s1105_s29, %s1105_s29 }
 0x456   : > { %p1599_p13 = scmp.ne.s32.totalorder %s1105_s29, %s1598_s9  ;;  %p1606_p6 = scmp.lt.s32.totalorder %s1598_s9, %s1598_s9 }
 0x458   : > { %p1600_p2 = pnand %p1599_p13, %p1384_p11  ;;  %p1607_p4 = por %p1606_p6, %p1605_p0 }
 0x45a   : > { %p1601_p3 = pneg %p1600_p2 }
 0x45c   : > { %p1608_p5 = pnand %p1607_p4, %p1601_p3 }
 0x45e   : > { %1611 = shalt.err (!%p1608_p5)
}
 0x45f   : > { %s1612_s16 = scalar_lea.hbm %s2044_s5, 2048 }
 0x460   : > { %p1613_p12 = scmp.ne.s32.totalorder %s2044_s5, %s1612_s16  ;;  %p1618_p8 = scmp.lt.u32.totalorder %s1612_s16, %s2044_s5 }
 0x462   : > { %p1614_p1 = pnand %p1613_p12, %p1384_p11 }
 0x464   : > { %p1615_p7 = pneg %p1614_p1 }
 0x466   : > { %p1620_p9 = pnand %p1618_p8, %p1615_p7 }
 0x468   : > { %1623 = shalt.err (!%p1620_p9)
}
 0x469   : > { %s1700_s13 = smov 128   ;;  %s1701_s7 = smov 8  }
 0x46a   : > { %1367 = dma.vmem_to_hbm [thread:$0]  (%p1384_p11), %s1105_s29, 2048, %s2044_s5, [#allocation9], %s1700_s13, %s1700_s13, %s1701_s7  }
 0x46b   : > { %1661 = dma.done.wait (%p1384_p11), [#allocation9], 2048  }
 0x46c   : > { %1663 = vsyncadd (%p1384_p11), [#allocation9], 4294965248 }
 0x46d PF: > { %s22_s23 = sadd.s32 1, %s1686_s23   ;;  %s2059_s18 = smov %s1670_s19 }
 0x46e   : > { %p19_p10 = scmp.ge.s32.totalorder %s22_s23, 5   ;;  %s2060_s19 = smov %s1674_s20 }
 0x46f   : > { %s2061_s20 = smov %s1817_s8  ;;  %s2062_s21 = smov %s1682_s22 }
 0x470   : > { %s2063_s22 = smov %s2065_s30  ;;  %21 = sbr.rel (!%p19_p10) target bundleno = 7 (0x7), region = 119 }
 0x477   :  { %1120 = vsyncpa [#allocation8], 1 }
 0x478   :  { %1122 = vsyncpa [#allocation8 + $0x1], 1 }
 0x479   :  { %1123 = vsyncpa [#allocation11], 1 }
 0x47a   :  { %1125 = vsyncpa [#allocation11 + $0x1], 1 }
 0x47b   :  { %1126 = vsyncpa [#allocation9], 1 }
 0x47c   :  { %1128 = vsyncpa [#allocation9 + $0x1], 1 }

</bundles_post_ra>
